<compile_context>
chip_gen: v7x
topology: tpu7x:2x2x1
jax: 0.10.0
libtpu: 0.0.40
codegen_flags: <defaults>
</compile_context>

<pallas_src>
import functools

import jax
import jax.numpy as jnp
from jax.experimental import pallas as pl
from jax.experimental.pallas import tpu as pltpu

_NEG_BIG = -1e32  # same masking constant as the torch module


def _round_up(x, m):
    return (x + m - 1) // m * m


def _softmax_rows(logits):
    """Numerically stable softmax over the last axis; returns (prob, rowmax, rowsum)."""
    m = jnp.max(logits, axis=-1, keepdims=True)
    e = jnp.exp(logits - m)
    s = jnp.sum(e, axis=-1, keepdims=True)
    return e * pl.reciprocal(s, approx=False), m, s


# ------------------------------- kernels -------------------------------------

def _prob_kernel(x_ref, w_ref, b_ref, prob_ref):
    # logits = x @ W + b ; padded tag lanes carry bias = -1e32 so they vanish in softmax.
    logits = jnp.dot(x_ref[...], w_ref[...], preferred_element_type=jnp.float32)
    logits = logits + b_ref[...]
    prob, _, _ = _softmax_rows(logits)
    prob_ref[...] = prob.astype(prob_ref.dtype)


def _prob_mask_kernel(x_ref, w_ref, b_ref, mask_ref, prob_ref):
    logits = jnp.dot(x_ref[...], w_ref[...], preferred_element_type=jnp.float32)
    logits = logits + b_ref[...]
    # Additive mask bias ((1 - mask) * -1e32).  The additive form keeps the padded tag
    # lanes (bias -1e32 -> total -2e32) strictly below real-tag lanes even on masked rows.
    logits = logits + jnp.where(mask_ref[...] > 0, 0.0, _NEG_BIG)
    prob, _, _ = _softmax_rows(logits)
    prob_ref[...] = prob.astype(prob_ref.dtype)


def _prob_loss_kernel(pad_code, x_ref, w_ref, b_ref, col_ref, prob_ref, part_ref):
    logits = jnp.dot(x_ref[...], w_ref[...], preferred_element_type=jnp.float32)
    logits = logits + b_ref[...]

    packed = col_ref[...]                  # (tm, 1) int32: (mask_bit << 16) | label
    label = packed & 0xFFFF                # (tm, 1)
    mask_bit = packed >> 16                # (tm, 1), 0 or 1
    logits = logits + jnp.where(mask_bit > 0, 0.0, _NEG_BIG)

    prob, m, s = _softmax_rows(logits)
    prob_ref[...] = prob.astype(prob_ref.dtype)

    # log-softmax gathered at the label lane via a select on the lane iota (LSE reused).
    # NOTE: labels outside [0, num_tags) silently pick a padded lane / contribute nothing,
    # unlike torch's CrossEntropyLoss which would raise.
    logp = (logits - m) - jnp.log(s)                          # (tm, T_pad)
    lane = jax.lax.broadcasted_iota(jnp.int32, logp.shape, 1)
    picked = jnp.sum(jnp.where(lane == label, logp, 0.0), axis=-1, keepdims=True)

    valid = label != pad_code                                 # ignore_index mask, (tm, 1)
    validf = valid.astype(jnp.float32)
    nll = jnp.where(valid, -picked, 0.0)                      # (tm, 1)

    # Per-tile partial sums packed into lanes 0/1 of a tiny (1, 8, 128) output tile.
    tm = nll.shape[0]
    lanes = jax.lax.broadcasted_iota(jnp.int32, (tm, 128), 1)
    contrib = jnp.where(lanes == 0, nll, jnp.where(lanes == 1, validf, 0.0))
    part_row = jnp.sum(contrib, axis=0, keepdims=True)        # (1, 128)
    part_ref[...] = jnp.broadcast_to(part_row.reshape(1, 1, 128), part_ref.shape)


# ------------------------------- wrapper --------------------------------------

def _choose_tile(N, H, T_pad, prob_itemsize, tm_max):
    # Bytes per token row in revolving (double-buffered) VMEM: f32 x row, prob out row,
    # one (tm, 1) side column (lane-padded to 128 lanes in VMEM).
    per_row = 2 * (H * 4 + T_pad * prob_itemsize + 128 * 4)
    budget = 14 * 1024 * 1024
    tm = min(tm_max, max(16, (budget // per_row) // 16 * 16))
    tm = min(tm, max(16, _round_up(N, 16)))
    # v7x has 2 TensorCores: make the 'parallel' grid axis have >= 2 steps when possible.
    if tm >= N and N > 16:
        tm = max(16, _round_up((N + 1) // 2, 16))
    return tm


def tagging_fnn_decoder(hiddens, mask, weight, bias, labels=None, pad_id=0,
                        prob_dtype=jnp.float32, tm_max=1024):
    """JAX/Pallas equivalent of TaggingFNNDecoder.forward.

    hiddens: [B, L, H] float32
    mask:    [B, L] (1 = real token, 0 = pad) or None (torch's `if mask:` read as "is not None")
    labels:  [B, L] int (0 <= label < 65536) or None
    weight:  [H, T] float32 (transposed vs. nn.Linear's [T, H]); bias: [T] float32
    pad_id:  CrossEntropyLoss ignore_index
    prob_dtype: dtype of the returned probabilities (bf16 halves the dominant HBM write
                if downstream tolerates ~1e-2 error; default f32 for torch parity).
    Loss is NaN (0/0) when every label equals pad_id -- matches torch.
    """
    B, L, H = hiddens.shape
    T = weight.shape[1]
    N = B * L
    T_pad = _round_up(T, 128)
    prob_itemsize = jnp.dtype(prob_dtype).itemsize

    tm = _choose_tile(N, H, T_pad, prob_itemsize, tm_max)
    N_pad = _round_up(N, tm)
    num_tiles = N_pad // tm
    grid = (num_tiles,)

    # x stays f32, padded along the token axis only (and only when needed).
    x = hiddens.reshape(N, H).astype(jnp.float32)
    if N_pad != N:
        x = jnp.pad(x, ((0, N_pad - N), (0, 0)))

    # Weight zero-padded on the tag axis; padded tag lanes get bias -1e32 so their softmax
    # contribution is exactly zero.
    w = weight.astype(jnp.float32)
    if T_pad != T:
        w = jnp.pad(w, ((0, 0), (0, T_pad - T)))
    b = jnp.full((1, T_pad), _NEG_BIG, jnp.float32).at[0, :T].set(bias.astype(jnp.float32))

    x_spec = pl.BlockSpec((tm, H), lambda i: (i, 0))
    # Resident weight / bias.  NOTE(v7x): for very large H*T these could additionally be
    # single-buffered via pipeline_mode=pl.Buffered(1); left at default since tagging
    # heads are small and correctness/compile safety comes first.
    w_spec = pl.BlockSpec((H, T_pad), lambda i: (0, 0))
    b_spec = pl.BlockSpec((1, T_pad), lambda i: (0, 0))
    col_spec = pl.BlockSpec((tm, 1), lambda i: (i, 0))
    prob_spec = pl.BlockSpec((tm, T_pad), lambda i: (i, 0))

    # Scoped-VMEM limit: revolving tiles are double-buffered by Pallas; v5e's default
    # scoped limit is only 16 MiB, so raise it explicitly (harmless on v6e/v7x).
    revolving = 2 * tm * (H * 4 + T_pad * prob_itemsize + 128 * 4) + 2 * 8 * 128 * 4
    resident = 2 * (H * T_pad * 4 + T_pad * 4)
    vmem_limit = int(min(48 * 2 ** 20, max(32 * 2 ** 20, revolving + resident + 4 * 2 ** 20)))
    cparams = pltpu.CompilerParams(dimension_semantics=("parallel",),
                                   vmem_limit_bytes=vmem_limit)
    cost = pl.CostEstimate(
        flops=2 * N_pad * H * T_pad,
        transcendentals=N_pad * T_pad,
        bytes_accessed=(N_pad * H * 4 + H * T_pad * 4 + T_pad * 4 + N_pad * 4
                        + N_pad * T_pad * prob_itemsize + num_tiles * 8 * 128 * 4),
    )

    prob_struct = jax.ShapeDtypeStruct((N_pad, T_pad), prob_dtype)

    if labels is None:
        if mask is None:
            prob_padded = pl.pallas_call(
                _prob_kernel, out_shape=prob_struct, grid=grid,
                in_specs=[x_spec, w_spec, b_spec], out_specs=prob_spec,
                compiler_params=cparams, cost_estimate=cost,
            )(x, w, b)
        else:
            mcol = (mask.reshape(N, 1) != 0).astype(jnp.int32)
            if N_pad != N:
                mcol = jnp.pad(mcol, ((0, N_pad - N), (0, 0)))
            prob_padded = pl.pallas_call(
                _prob_mask_kernel, out_shape=prob_struct, grid=grid,
                in_specs=[x_spec, w_spec, b_spec, col_spec], out_specs=prob_spec,
                compiler_params=cparams, cost_estimate=cost,
            )(x, w, b, mcol)
        # TODO(synk): consumers that accept the padded (N_pad, T_pad) slab could skip this
        # slice copy entirely (it is a second pass over the prob bytes).
        return prob_padded[:N, :T].reshape(B, L, T)

    # ---- training path: mask bit + label packed into one int32 side column ----
    pad_code = pad_id & 0xFFFF
    lab = labels.reshape(N).astype(jnp.int32) & 0xFFFF
    if mask is None:
        mbit = jnp.ones((N,), jnp.int32)
    else:
        mbit = (mask.reshape(N) != 0).astype(jnp.int32)
    packed = (lab | (mbit << 16)).reshape(N, 1)
    if N_pad != N:   # padded rows: mask bit 0, label == pad_code -> ignored by the loss
        packed = jnp.pad(packed, ((0, N_pad - N), (0, 0)), constant_values=pad_code)

    part_spec = pl.BlockSpec((1, 8, 128), lambda i: (i, 0, 0))
    prob_padded, parts = pl.pallas_call(
        functools.partial(_prob_loss_kernel, pad_code),
        out_shape=(prob_struct, jax.ShapeDtypeStruct((num_tiles, 8, 128), jnp.float32)),
        grid=grid,
        in_specs=[x_spec, w_spec, b_spec, col_spec],
        out_specs=[prob_spec, part_spec],
        compiler_params=cparams, cost_estimate=cost,
    )(x, w, b, packed)

    # CrossEntropyLoss(ignore_index=pad_id): mean over non-ignored tokens.
    loss = jnp.sum(parts[:, 0, 0]) / jnp.sum(parts[:, 0, 1])
    prob = prob_padded[:N, :T].reshape(B, L, T)
    return prob, loss


if __name__ == "__main__":
    key = jax.random.PRNGKey(0)
    B, L, H, T = 2, 8, 32, 10          # batch, seq, input_size, num_tags
    pad_id = 0

    k1, k2, k3, k4 = jax.random.split(key, 4)
    bound = 1.0 / (H ** 0.5)           # nn.Linear-style init U(-1/sqrt(H), 1/sqrt(H))
    weight = jax.random.uniform(k1, (H, T), jnp.float32, -bound, bound)
    bias = jax.random.uniform(k2, (T,), jnp.float32, -bound, bound)

    hiddens = jax.random.normal(k3, (B, L, H), jnp.float32)
    lengths = jnp.array([L, 5], jnp.int32)
    mask = (jnp.arange(L)[None, :] < lengths[:, None]).astype(jnp.float32)   # [B, L]
    labels = jax.random.randint(k4, (B, L), 1, T).astype(jnp.int32)
    labels = jnp.where(mask > 0, labels, pad_id)   # padded positions -> ignore_index

    prob, loss = tagging_fnn_decoder(hiddens, mask, weight, bias,
                                     labels=labels, pad_id=pad_id)
    prob_inf = tagging_fnn_decoder(hiddens, mask, weight, bias, labels=None, pad_id=pad_id)
    prob_nomask = tagging_fnn_decoder(hiddens, None, weight, bias, labels=None, pad_id=pad_id)
    prob_bf16, loss_bf16 = tagging_fnn_decoder(hiddens, mask, weight, bias, labels=labels,
                                               pad_id=pad_id, prob_dtype=jnp.bfloat16)
    jax.block_until_ready((prob, loss, prob_inf, prob_nomask, prob_bf16, loss_bf16))

    # ---- pure-JAX f32 reference (HIGHEST-precision matmul == torch's f32 nn.Linear) ----
    hp = jax.lax.Precision.HIGHEST
    logits_ref = jnp.einsum("blh,ht->blt", hiddens, weight, precision=hp) + bias
    logits_m = logits_ref + (1.0 - mask)[..., None] * _NEG_BIG
    prob_ref = jax.nn.softmax(logits_m, axis=-1)
    prob_nomask_ref = jax.nn.softmax(logits_ref, axis=-1)
    logp_ref = jax.nn.log_softmax(logits_m, axis=-1).reshape(-1, T)
    lab_flat = labels.reshape(-1)
    nll_ref = -jnp.take_along_axis(logp_ref, lab_flat[:, None], axis=1)[:, 0]
    valid_ref = (lab_flat != pad_id).astype(jnp.float32)
    loss_ref = jnp.sum(nll_ref * valid_ref) / jnp.sum(valid_ref)

    assert prob.shape == (B, L, T) and prob.dtype == jnp.float32
    assert jnp.allclose(prob, prob_ref, atol=2e-3), "prob mismatch"
    assert jnp.allclose(prob_inf, prob_ref, atol=2e-3), "inference prob mismatch"
    assert jnp.allclose(prob_nomask, prob_nomask_ref, atol=2e-3), "no-mask prob mismatch"
    assert jnp.allclose(loss, loss_ref, atol=5e-3, rtol=5e-3), "loss mismatch"
    assert prob_bf16.dtype == jnp.bfloat16
    assert jnp.allclose(prob_bf16.astype(jnp.float32), prob_ref, atol=1e-2), "bf16 prob mismatch"
    assert jnp.allclose(loss_bf16, loss_ref, atol=5e-3, rtol=5e-3), "bf16-path loss mismatch"

    print("KERNEL_OK")
</pallas_src>

<mosaic_0001>
module attributes {stable_mosaic.version = 11 : i64} {
  func.func @_prob_loss_kernel(%arg0: i32, %arg1: memref<16x32xf32, #tpu.memory_space<vmem>>, %arg2: memref<32x128xf32, #tpu.memory_space<vmem>>, %arg3: memref<1x128xf32, #tpu.memory_space<vmem>>, %arg4: memref<16x1xi32, #tpu.memory_space<vmem>>, %arg5: memref<16x128xf32, #tpu.memory_space<vmem>>, %arg6: memref<1x8x128xf32, #tpu.memory_space<vmem>>) attributes {dimension_semantics = [#tpu.dimension_semantics<parallel>], iteration_bounds = array<i64: 1>, scalar_prefetch = 0 : i64, scratch_operands = 0 : i64, tpu.core_type = #tpu.core_type<tc>, window_params = [{transform_indices = @transform_0, window_bounds = array<i64: 16, 32>}, {pipeline_mode = #tpu.pipeline_mode<synchronous>, transform_indices = @transform_1, window_bounds = array<i64: 32, 128>}, {pipeline_mode = #tpu.pipeline_mode<synchronous>, transform_indices = @transform_2, window_bounds = array<i64: 1, 128>}, {transform_indices = @transform_3, window_bounds = array<i64: 16, 1>}, {transform_indices = @transform_4, window_bounds = array<i64: 16, 128>}, {transform_indices = @transform_5, window_bounds = array<i64: 1, 8, 128>}]} {
    %c0 = arith.constant 0 : index
    %c0_0 = arith.constant 0 : index
    %0 = vector.load %arg1[%c0, %c0_0] : memref<16x32xf32, #tpu.memory_space<vmem>>, vector<16x32xf32>
    %c0_1 = arith.constant 0 : index
    %c0_2 = arith.constant 0 : index
    %1 = vector.load %arg2[%c0_1, %c0_2] : memref<32x128xf32, #tpu.memory_space<vmem>>, vector<32x128xf32>
    %cst = arith.constant dense<0.000000e+00> : vector<16x128xf32>
    %2 = tpu.matmul %0, %1, %cst {dimension_numbers = #tpu.dot_dimension_numbers<[1], [0], [0], [1], [0, 0, 1, 1], [], []>} : vector<16x32xf32>, vector<32x128xf32>, vector<16x128xf32> -> vector<16x128xf32>
    %c0_3 = arith.constant 0 : index
    %c0_4 = arith.constant 0 : index
    %3 = vector.load %arg3[%c0_3, %c0_4] : memref<1x128xf32, #tpu.memory_space<vmem>>, vector<1x128xf32>
    %4 = vector.broadcast %3 : vector<1x128xf32> to vector<16x128xf32>
    %5 = arith.addf %2, %4 : vector<16x128xf32>
    %c0_5 = arith.constant 0 : index
    %c0_6 = arith.constant 0 : index
    %6 = vector.load %arg4[%c0_5, %c0_6] : memref<16x1xi32, #tpu.memory_space<vmem>>, vector<16x1xi32>
    %c65535_i32 = arith.constant 65535 : i32
    %7 = vector.broadcast %c65535_i32 : i32 to vector<16x1xi32>
    %8 = arith.andi %6, %7 : vector<16x1xi32>
    %c16_i32 = arith.constant 16 : i32
    %9 = vector.broadcast %c16_i32 : i32 to vector<16x1xi32>
    %10 = arith.shrsi %6, %9 : vector<16x1xi32>
    %c0_i32 = arith.constant 0 : i32
    %11 = vector.broadcast %c0_i32 : i32 to vector<16x1xi32>
    %12 = arith.cmpi sgt, %10, %11 : vector<16x1xi32>
    %cst_7 = arith.constant 0.000000e+00 : f32
    %cst_8 = arith.constant -1.000000e+32 : f32
    %13 = vector.broadcast %cst_7 : f32 to vector<16x1xf32>
    %14 = vector.broadcast %cst_8 : f32 to vector<16x1xf32>
    %15 = arith.select %12, %13, %14 : vector<16x1xi1>, vector<16x1xf32>
    %16 = vector.broadcast %15 : vector<16x1xf32> to vector<16x128xf32>
    %17 = arith.addf %5, %16 : vector<16x128xf32>
    %cst_9 = arith.constant dense<0xFF800000> : vector<16xf32>
    %18 = vector.multi_reduction <maximumf>, %17, %cst_9 [1] : vector<16x128xf32> to vector<16xf32>
    %19 = vector.shape_cast %18 : vector<16xf32> to vector<16x1xf32>
    %20 = vector.broadcast %19 : vector<16x1xf32> to vector<16x128xf32>
    %21 = arith.subf %17, %20 : vector<16x128xf32>
    %22 = math.exp %21 : vector<16x128xf32>
    %cst_10 = arith.constant dense<0.000000e+00> : vector<16xf32>
    %23 = vector.multi_reduction <add>, %22, %cst_10 [1] : vector<16x128xf32> to vector<16xf32>
    %24 = vector.shape_cast %23 : vector<16xf32> to vector<16x1xf32>
    %25 = tpu.reciprocal %24 : vector<16x1xf32> -> vector<16x1xf32>
    %26 = vector.broadcast %25 : vector<16x1xf32> to vector<16x128xf32>
    %27 = arith.mulf %22, %26 : vector<16x128xf32>
    %c0_11 = arith.constant 0 : index
    %c0_12 = arith.constant 0 : index
    %28 = vector.load %arg5[%c0_11, %c0_12] : memref<16x128xf32, #tpu.memory_space<vmem>>, vector<16x128xf32>
    tpu.vector_store %arg5[%c0_11, %c0_12], %27 {strides = array<i32>} : memref<16x128xf32, #tpu.memory_space<vmem>>, vector<16x128xf32>,
    %29 = vector.broadcast %19 : vector<16x1xf32> to vector<16x128xf32>
    %30 = arith.subf %17, %29 : vector<16x128xf32>
    %31 = math.log %24 : vector<16x1xf32>
    %32 = vector.broadcast %31 : vector<16x1xf32> to vector<16x128xf32>
    %33 = arith.subf %30, %32 : vector<16x128xf32>
    %34 = tpu.iota {dimensions = array<i32: 1>} : vector<16x128xi32>
    %35 = vector.broadcast %8 : vector<16x1xi32> to vector<16x128xi32>
    %36 = arith.cmpi eq, %34, %35 : vector<16x128xi32>
    %cst_13 = arith.constant 0.000000e+00 : f32
    %37 = vector.broadcast %cst_13 : f32 to vector<16x128xf32>
    %38 = arith.select %36, %33, %37 : vector<16x128xi1>, vector<16x128xf32>
    %cst_14 = arith.constant dense<0.000000e+00> : vector<16xf32>
    %39 = vector.multi_reduction <add>, %38, %cst_14 [1] : vector<16x128xf32> to vector<16xf32>
    %40 = vector.shape_cast %39 : vector<16xf32> to vector<16x1xf32>
    %c0_i32_15 = arith.constant 0 : i32
    %41 = vector.broadcast %c0_i32_15 : i32 to vector<16x1xi32>
    %42 = arith.cmpi ne, %8, %41 : vector<16x1xi32>
    %43 = arith.extui %42 : vector<16x1xi1> to vector<16x1xi32>
    %44 = arith.sitofp %43 : vector<16x1xi32> to vector<16x1xf32>
    %cst_16 = arith.constant 0.000000e+00 : f32
    %45 = vector.broadcast %cst_16 : f32 to vector<16x1xf32>
    %46 = arith.subf %45, %40 : vector<16x1xf32>
    %cst_17 = arith.constant 0.000000e+00 : f32
    %47 = vector.broadcast %cst_17 : f32 to vector<16x1xf32>
    %48 = arith.select %42, %46, %47 : vector<16x1xi1>, vector<16x1xf32>
    %49 = tpu.iota {dimensions = array<i32: 1>} : vector<16x128xi32>
    %c0_i32_18 = arith.constant 0 : i32
    %50 = vector.broadcast %c0_i32_18 : i32 to vector<16x128xi32>
    %51 = arith.cmpi eq, %49, %50 : vector<16x128xi32>
    %c1_i32 = arith.constant 1 : i32
    %52 = vector.broadcast %c1_i32 : i32 to vector<16x128xi32>
    %53 = arith.cmpi eq, %49, %52 : vector<16x128xi32>
    %cst_19 = arith.constant 0.000000e+00 : f32
    %54 = vector.shape_cast %44 : vector<16x1xf32> to vector<16x1xf32>
    %55 = vector.broadcast %54 : vector<16x1xf32> to vector<16x128xf32>
    %56 = vector.broadcast %cst_19 : f32 to vector<16x128xf32>
    %57 = arith.select %53, %55, %56 : vector<16x128xi1>, vector<16x128xf32>
    %58 = vector.shape_cast %48 : vector<16x1xf32> to vector<16x1xf32>
    %59 = vector.broadcast %58 : vector<16x1xf32> to vector<16x128xf32>
    %60 = arith.select %51, %59, %57 : vector<16x128xi1>, vector<16x128xf32>
    %cst_20 = arith.constant dense<0.000000e+00> : vector<128xf32>
    %61 = vector.multi_reduction <add>, %60, %cst_20 [0] : vector<16x128xf32> to vector<128xf32>
    %62 = vector.shape_cast %61 : vector<128xf32> to vector<1x128xf32>
    %63 = vector.shape_cast %62 : vector<1x128xf32> to vector<1x1x128xf32>
    %64 = vector.shape_cast %63 : vector<1x1x128xf32> to vector<1x1x128xf32>
    %65 = vector.broadcast %64 : vector<1x1x128xf32> to vector<1x8x128xf32>
    %c0_21 = arith.constant 0 : index
    %c0_22 = arith.constant 0 : index
    %c0_23 = arith.constant 0 : index
    %66 = vector.load %arg6[%c0_21, %c0_22, %c0_23] : memref<1x8x128xf32, #tpu.memory_space<vmem>>, vector<1x8x128xf32>
    tpu.vector_store %arg6[%c0_21, %c0_22, %c0_23], %65 {strides = array<i32>} : memref<1x8x128xf32, #tpu.memory_space<vmem>>, vector<1x8x128xf32>,
    return
  }
  func.func @transform_0(%arg0: i32) -> (i32, i32) {
    %c0_i32 = arith.constant 0 : i32
    %c0_i32_0 = arith.constant 0 : i32
    return %arg0, %c0_i32 : i32, i32
  }
  func.func @transform_1(%arg0: i32) -> (i32, i32) {
    %c0_i32 = arith.constant 0 : i32
    %c0_i32_0 = arith.constant 0 : i32
    %c0_i32_1 = arith.constant 0 : i32
    return %c0_i32, %c0_i32_0 : i32, i32
  }
  func.func @transform_2(%arg0: i32) -> (i32, i32) {
    %c0_i32 = arith.constant 0 : i32
    %c0_i32_0 = arith.constant 0 : i32
    %c0_i32_1 = arith.constant 0 : i32
    return %c0_i32, %c0_i32_0 : i32, i32
  }
  func.func @transform_3(%arg0: i32) -> (i32, i32) {
    %c0_i32 = arith.constant 0 : i32
    %c0_i32_0 = arith.constant 0 : i32
    return %arg0, %c0_i32 : i32, i32
  }
  func.func @transform_4(%arg0: i32) -> (i32, i32) {
    %c0_i32 = arith.constant 0 : i32
    %c0_i32_0 = arith.constant 0 : i32
    return %arg0, %c0_i32 : i32, i32
  }
  func.func @transform_5(%arg0: i32) -> (i32, i32, i32) {
    %c0_i32 = arith.constant 0 : i32
    %c0_i32_0 = arith.constant 0 : i32
    %c0_i32_1 = arith.constant 0 : i32
    return %arg0, %c0_i32, %c0_i32_0 : i32, i32, i32
  }
}

</mosaic_0001>

<bundles_post_ra>
// kernel: tpu_custom_call.1
= control target key start
LH: loop header
LB: loop body
LE: loop exit
PB: predicated region body
PF: predicated region fallthrough
CT: control target
= control target key end

     0   :  { %11 = vsyncpa [#allocation3], 0  ;;  %s509_s0 = inlined_call_operand.vmem [shape: f32[16,32], index: 0, kind: input, shape index: {}]   ;;  %s510_s1 = inlined_call_operand.hbm [shape: f32[32,128], index: 1, kind: input, shape index: {}]   ;;  %s511_s2 = inlined_call_operand.vmem [shape: f32[1,128], index: 2, kind: input, shape index: {}]   ;;  %s512_s3 = inlined_call_operand.vmem [shape: s32[16,1], index: 3, kind: input, shape index: {}]   ;;  %s513_s4 = inlined_call_operand.hbm [shape: f32[16,128], index: 4, kind: output, shape index: {0}]   ;;  %s514_s5 = inlined_call_operand.hbm [shape: f32[1,8,128], index: 5, kind: output, shape index: {1}]  }
   0x1   :  { %12 = vsyncpa [#allocation4], 0 }
   0x2   :  { %13 = vsyncpa [#allocation7], 0  ;;  %s398_s18 = smov [#allocation2]   ;;  %s326_s22 = scalar_lea.hbm %s510_s1, 512 }
   0x3   :  { %s21_s19 = sshll.u32 %s398_s18, 4  ;;  %p327_p0 = scmp.ne.s32.totalorder %s510_s1, %s326_s22  ;;  %s22_s19 = int_to_ptr.vmem [resolvable:$true] %s21_s19 }
   0x4   :  { %p330_p1 = scmp.lt.u32.totalorder %s326_s22, %s510_s1 }
   0x6   :  { %p332_p2 = pnand %p330_p1, %p327_p0 }
   0x8   :  { %335 = shalt.err (!%p332_p2)
}
   0x9   :  { %s336_s27 = scalar_lea.vmem %s22_s19, 512  ;;  %p341_p4 = scmp.lt.s32.totalorder %s22_s19, %s22_s19 }
   0xa   :  { %p337_p3 = scmp.ne.s32.totalorder %s22_s19, %s336_s27  ;;  %p342_p5 = scmp.lt.s32.totalorder %s336_s27, %s336_s27 }
   0xc   :  { %p343_p6 = por %p342_p5, %p341_p4 }
   0xe   :  { %p344_p7 = pnand %p343_p6, %p337_p3 }
  0x10   :  { %347 = shalt.err (!%p344_p7)
}
  0x11   :  { %s399_s28 = smov 128   ;;  %s400_s29 = smov 8  }
  0x12   :  { %27 = dma.hbm_to_vmem [thread:$0]  %s510_s1, 512, %s22_s19, [#allocation3], %s399_s28, %s399_s28, %s400_s29  }
  0x13   :  { %392 = dma.done.wait [#allocation3], 512  }
  0x14   :  { %393 = vsyncadd [#allocation3], 4294966784  ;;  %v401_v0 = vmov 0   ;;  %vm48_vm0 = vcmask 261120   ;;  %v37_v1 = vld [vmem:[#allocation2] sm:$0xff]  ;;  %v38_v2 = vld [vmem:[#allocation2 + $0x8] sm:$0xff]  ;;  %v178_v37 = vlaneseq }
  0x15   :  { %307 = vset.pattern.permute.xlu0 %v401_v0  ;;  %308 = vset.pattern.permute.xlu1 %v401_v0  ;;  %v39_v3 = vld [vmem:[#allocation2 + $0x10] sm:$0xff]  ;;  %v291_v4 = vpack.c.bf16 %v38_v2, %v37_v1  ;;  %v40_v5 = vld [vmem:[#allocation2 + $0x18] sm:$0xff]  ;;  %v35_v6 = vld [vmem:[%s509_s0] sm:$0xff]  ;;  %v402_v12 = vmov -1e+32   ;;  %v403_v53 = vmov 0.0  }
  0x16   :  { %v295_v7 = vpack.c.bf16 %v40_v5, %v39_v3  ;;  %288 = vmatprep.mubr.msk.f32.mxu0 %vm48_vm0, %v35_v6  ;;  %v458_v8 = vld [vmem:[%s512_s3] sm:$0xff]  ;;  %v463_v9 = vld [vmem:[%s512_s3 + $0x8] sm:$0xff]  ;;  %v476_v38 = vand.u32 127, %v178_v37 }
  0x17   :  { %292 = vmatprep.subr.bf16.mxu0 %v291_v4  ;;  %v134_v10 = vshra.s32 %v458_v8, 16  ;;  %v135_v11 = vshra.s32 %v463_v9, 16  ;;  %v36_v14 = vld [vmem:[%s509_s0 + $0x8] sm:$0xff]  ;;  %v269_v17 = vld [vmem:[%s511_s2] ss:$0 sm:$0xff]  ;;  %v132_v33 = vand.u32 65535, %v458_v8 }
  0x18   :  { %294 = vmatpush3.bf16.msra.mxu0 %v291_v4  ;;  %v133_v34 = vand.u32 65535, %v463_v9  ;;  %s404_s0 = smov [#allocation5]  }
  0x19   :  { %296 = vmatprep.subr.bf16.mxu0 %v295_v7  ;;  %vm136_vm1 = vcmp.gt.s32.totalorder %v134_v10, 0  ;;  %vm137_vm2 = vcmp.gt.s32.totalorder %v135_v11, 0  ;;  %vm194_vm5 = vcmp.ne.s32.totalorder %v132_v33, 0  ;;  %s243_s2 = sshll.u32 %s404_s0, 4  ;;  %s244_s2 = int_to_ptr.vmem [resolvable:$true] %s243_s2 }
  0x1a   :  { %v138_v13 = vsel %vm136_vm1, 0.0, %v402_v12  ;;  %v139_v15 = vsel %vm137_vm2, 0.0, %v402_v12  ;;  %vm195_vm6 = vcmp.ne.s32.totalorder %v133_v34, 0  ;;  %v272_v54 = vsel %vm194_vm5, 1.0, %v403_v53  ;;  %s348_s15 = scalar_lea.vmem %s244_s2, 256  ;;  %p353_p9 = scmp.lt.s32.totalorder %s244_s2, %s244_s2 }
  0x1b   :  { %142 = vperm.xlu0 %307, %v138_v13   ;;  %v273_v55 = vsel %vm195_vm6, 1.0, %v403_v53  ;;  %p349_p8 = scmp.ne.s32.totalorder %s244_s2, %s348_s15  ;;  %p354_p10 = scmp.lt.s32.totalorder %s348_s15, %s348_s15 }
  0x1c   :  { %298 = vmatpush3.bf16.msra.mxu0 %v295_v7  ;;  %v309_v56 = vpack.i.bf16 %v273_v55, %v272_v54 }
  0x1d   :  { %p355_p11 = por %p354_p10, %p353_p9 }
  0x1f   :  { %289 = vmatmul.mubr.msk.f32.vlgmr.msra.gmra.mrb[0].mxu0 %vm48_vm0, %v36_v14  ;;  %147 = vperm.xlu0 %307, %v139_v15   ;;  %p356_p12 = pnand %p355_p11, %p349_p8 }
  0x9a   :  { %v143_v16 = vpop.permute.xlu0 %142 }
  0x9e   :  { %v148_v23 = vpop.permute.xlu0 %147 }
  0xf2   :  { %v290_v18 = vpop.f32.mrb[0].mxu0 }
  0xf3   :  { %v121_v19 = vpop.f32.mrb[1].mxu0  ;;  %v127_v21 = vadd.f32 %v290_v18, %v269_v17 }
  0xf4   :  { %v122_v20 = vadd.f32 %v269_v17, %v121_v19 }
  0xf5   :  { %v151_v24 = vadd.f32 %v148_v23, %v127_v21 }
  0xf6   :  { %v150_v22 = vadd.f32 %v143_v16, %v122_v20 }
  0xf8   :  { %152 = vmax.xlane.f32.xlu1 %v150_v22 }
  0xfc   :  { %154 = vmax.xlane.f32.xlu1 %v151_v24 }
 0x185   :  { %v153_v25 = vpop.xlane.xlu1 %152 }
 0x186   :  { %v156_v26 = vsub.f32 %v150_v22, %v153_v25 }
 0x188   :  { %v158_v27 = vmul.f32 1.442695, %v156_v26 }
 0x189   :  { %v155_v28 = vpop.xlane.xlu1 %154 }
 0x18a   :  { %314 = vpow2.f32 %v158_v27  ;;  %v157_v29 = vsub.f32 %v151_v24, %v155_v28 }
 0x18c   :  { %v160_v30 = vmul.f32 1.442695, %v157_v29 }
 0x18e   :  { %316 = vpow2.f32 %v160_v30 }
 0x194   :  { %v315_v31 = vpop.eup %314 }
 0x195   :  { %162 = vadd.xlane.f32.xlu0 %v315_v31 }
 0x198   :  { %v317_v32 = vpop.eup %316 }
 0x199   :  { %164 = vadd.xlane.f32.xlu1 %v317_v32 }
 0x1aa   :  { %181 = vperm.xlu1 %308, %v132_v33  }
 0x1ae   :  { %184 = vperm.xlu1 %308, %v133_v34  }
 0x222   :  { %v163_v35 = vpop.xlane.xlu0 %162 }
 0x223   :  { %318 = vrcp.f32 %v163_v35 }
 0x224   :  { %320 = vlog2.f32 %v163_v35 }
 0x226   :  { %v165_v36 = vpop.xlane.xlu1 %164 }
 0x227   :  { %322 = vrcp.f32 %v165_v36 }
 0x228   :  { %324 = vlog2.f32 %v165_v36 }
 0x22a   :  { %v182_v40 = vpop.permute.xlu1 %181 }
 0x22b   :  { %vm186_vm3 = vcmp.eq.s32.totalorder %v476_v38, %v182_v40 }
 0x22d   :  { %v319_v39 = vpop.eup %318 }
 0x22e   :  { %v321_v41 = vpop.eup %320  ;;  %v168_v42 = vmul.f32 %v319_v39, %v315_v31  ;;  %v185_v48 = vpop.permute.xlu1 %184 }
 0x22f   :  { %v173_v43 = vmul.f32 0.6931472, %v321_v41  ;;  %vm187_vm4 = vcmp.eq.s32.totalorder %v476_v38, %v185_v48 }
 0x230   :  { %170 = vst [vmem:[#allocation5] sm:$0xff] %v168_v42 }
 0x231   :  { %v323_v44 = vpop.eup %322  ;;  %v176_v45 = vsub.f32 %v156_v26, %v173_v43 }
 0x232   :  { %v325_v46 = vpop.eup %324  ;;  %v169_v47 = vmul.f32 %v323_v44, %v317_v32 }
 0x233   :  { %v188_v49 = vsel %vm186_vm3, %v176_v45, 0.0  ;;  %v175_v50 = vmul.f32 0.6931472, %v325_v46 }
 0x234   :  { %190 = vadd.xlane.f32.xlu1 %v188_v49  ;;  %171 = vst [vmem:[#allocation5 + $0x8] sm:$0xff] %v169_v47 }
 0x235   :  { %v177_v51 = vsub.f32 %v157_v29, %v175_v50 }
 0x237   :  { %v189_v52 = vsel %vm187_vm4, %v177_v51, 0.0 }
 0x238   :  { %192 = vadd.xlane.f32.xlu0 %v189_v52 }
 0x24e   :  { %310 = vperm.xlu0 %307, %v309_v56  }
 0x2c1   :  { %v191_v57 = vpop.xlane.xlu1 %190 }
 0x2c2   :  { %v200_v58 = vsub.f32 0.0, %v191_v57 }
 0x2c4   :  { %v202_v59 = vsel %vm194_vm5, %v200_v58, 0.0 }
 0x2c5   :  { %v193_v60 = vpop.xlane.xlu0 %192  ;;  %220 = vperm.xlu0 %307, %v202_v59  }
 0x2c6   :  { %v201_v61 = vsub.f32 0.0, %v193_v60 }
 0x2c8   :  { %v203_v62 = vsel %vm195_vm6, %v201_v61, 0.0 }
 0x2c9   :  { %225 = vperm.xlu0 %307, %v203_v62  }
 0x2ca   :  { %359 = shalt.err (!%p356_p12)
}
 0x2cb   :  { %s360_s18 = scalar_lea.hbm %s513_s4, 256 }
 0x2cc   :  { %p361_p13 = scmp.ne.s32.totalorder %s513_s4, %s360_s18  ;;  %p364_p0 = scmp.lt.u32.totalorder %s360_s18, %s513_s4 }
 0x2ce   :  { %p366_p1 = pnand %p364_p0, %p361_p13 }
 0x2d0   :  { %369 = shalt.err (!%p366_p1)
}
 0x2d1   :  { %249 = dma.vmem_to_hbm [thread:$0]  %s244_s2, 256, %s513_s4, [#allocation4], %s399_s28, %s399_s28, %s400_s29   ;;  %v311_v63 = vpop.permute.xlu0 %310  ;;  %vm205_vm7 = vcmp.eq.s32.totalorder %v476_v38, 1  ;;  %vm204_vm8 = vcmp.eq.s32.totalorder %v476_v38, 0 }
 0x2d2   :  { %v313_v0 = vunpack.i.h.bf16 %v311_v63  ;;  %v312_v1 = vunpack.i.l.bf16 %v311_v63  ;;  %s405_s25 = smov [#allocation6]  }
 0x2d3   :  { %s256_s4 = sshll.u32 %s405_s25, 4  ;;  %s257_s4 = int_to_ptr.vmem [resolvable:$true] %s256_s4 }
 0x2d4   :  { %v217_v3 = vsel %vm205_vm7, %v313_v0, 0.0  ;;  %v216_v4 = vsel %vm205_vm7, %v312_v1, 0.0  ;;  %s370_s26 = scalar_lea.vmem %s257_s4, 128  ;;  %p375_p3 = scmp.lt.s32.totalorder %s257_s4, %s257_s4 }
 0x2d5   :  { %p371_p2 = scmp.ne.s32.totalorder %s257_s4, %s370_s26  ;;  %p376_p4 = scmp.lt.s32.totalorder %s370_s26, %s370_s26 }
 0x2d7   :  { %p377_p5 = por %p376_p4, %p375_p3 }
 0x2d9   :  { %p378_p6 = pnand %p377_p5, %p371_p2 }
 0x344   :  { %v221_v2 = vpop.permute.xlu0 %220 }
 0x345   :  { %v228_v6 = vsel %vm204_vm8, %v221_v2, %v216_v4 }
 0x348   :  { %v226_v5 = vpop.permute.xlu0 %225 }
 0x349   :  { %v229_v7 = vsel %vm204_vm8, %v226_v5, %v217_v3 }
 0x34a   :  { %v230_v8 = vadd.f32 %v229_v7, %v228_v6 }
 0x34c   :  { %v231_v9 = vrot.slane %v230_v8, 4 }
 0x34e   :  { %v232_v10 = vadd.f32 %v231_v9, %v230_v8 }
 0x350   :  { %v233_v11 = vrot.slane %v232_v10, 2 }
 0x352   :  { %v234_v12 = vadd.f32 %v233_v11, %v232_v10 }
 0x354   :  { %v235_v13 = vrot.slane %v234_v12, 1 }
 0x356   :  { %v236_v14 = vadd.f32 %v235_v13, %v234_v12 }
 0x358   :  { %237 = vst [vmem:[#allocation6] sm:$0xff] %v236_v14 }
 0x359   :  { %381 = shalt.err (!%p378_p6)
}
 0x35a   :  { %s382_s29 = scalar_lea.hbm %s514_s5, 128 }
 0x35b   :  { %p383_p7 = scmp.ne.s32.totalorder %s514_s5, %s382_s29  ;;  %p386_p8 = scmp.lt.u32.totalorder %s382_s29, %s514_s5 }
 0x35d   :  { %p388_p9 = pnand %p386_p8, %p383_p7 }
 0x35f   :  { %391 = shalt.err (!%p388_p9)
}
 0x360   :  { %259 = dma.vmem_to_hbm [thread:$0]  %s257_s4, 128, %s514_s5, [#allocation7]  }
 0x361   :  { %394 = dma.done.wait [#allocation4], 256  }
 0x362   :  { %395 = vsyncadd [#allocation4], 4294967040 }
 0x363   :  { %396 = dma.done.wait [#allocation7], 128  }
 0x364   :  { %397 = vsyncadd [#allocation7], 4294967168 }
 0x365   :  { %266 = vsyncpa [#allocation3], 1 }
 0x366   :  { %267 = vsyncpa [#allocation4], 1 }
 0x367   :  { %268 = vsyncpa [#allocation7], 1 }

</bundles_post_ra>
